<compile_context>
chip_gen: v6e
topology: v6e:2x2x1
jax: 0.10.0
libtpu: 0.0.40
codegen_flags: <defaults>
</compile_context>

<pallas_src>
import functools
import math

import jax
import jax.numpy as jnp
from jax.experimental import pallas as pl
from jax.experimental.pallas import tpu as pltpu


# ----------------------------- Pallas kernels ------------------------------ #
def _cat_conv_bn_relu_up_kernel(x_ref, y_ref, g_ref, wx_ref, wy_ref, b_ref,
                                o_ref, *, expand_input):
    # x_ref: (1, Cx, ts//4)  half-res high branch tile
    # y_ref: (1, Cy, ts)     low branch tile (full res)
    # g_ref: (ts//4, ts)     constant nearest-2x expansion matrix
    # wx/wy: (Cout, Cx) / (Cout, Cy)   b_ref: (Cout, 1)
    # o_ref: (1, Cout, ts)
    if expand_input:
        # expand the (cheaper) Cx-channel half-res tile to full res, then conv
        x_up = jnp.dot(x_ref[0], g_ref[...],
                       preferred_element_type=jnp.float32)          # (Cx, ts)
        acc = jnp.dot(wx_ref[...], x_up,
                      preferred_element_type=jnp.float32)           # (Cout, ts)
    else:
        # conv at half res, then expand the Cout-channel result
        hx = jnp.dot(wx_ref[...], x_ref[0],
                     preferred_element_type=jnp.float32)            # (Cout, ts//4)
        acc = jnp.dot(hx, g_ref[...],
                      preferred_element_type=jnp.float32)           # (Cout, ts)
    acc = acc + jnp.dot(wy_ref[...], y_ref[0],
                        preferred_element_type=jnp.float32)
    acc = acc + b_ref[...]
    o_ref[0] = jnp.maximum(acc, 0.0).astype(o_ref.dtype)


def _cat_conv_bn_relu_kernel(x_ref, y_ref, wx_ref, wy_ref, b_ref, o_ref):
    # x_ref: (1, Cx, ts)  y_ref: (1, Cy, ts)  o_ref: (1, Cout, ts)
    acc = jnp.dot(wx_ref[...], x_ref[0], preferred_element_type=jnp.float32)
    acc = acc + jnp.dot(wy_ref[...], y_ref[0],
                        preferred_element_type=jnp.float32)
    acc = acc + b_ref[...]
    o_ref[0] = jnp.maximum(acc, 0.0).astype(o_ref.dtype)


# ----------------------------- tile selection ------------------------------ #
def _choose_row_tile(H, W, upsample, max_lanes=2048):
    """Pick output rows-per-tile `tr` and padded height `H_pad`.

    Guarantees: tr divides H_pad; ts = tr*W is either the full spatial extent
    or a multiple of 128 lanes; if `upsample`, tr is even and ts//4 is either
    the full half-res extent or a multiple of 128 lanes.
    """
    if H * W <= max_lanes:
        # one full-spatial tile per image -> full-dim blocks, no alignment rules
        return H, H
    if upsample:
        # need ts % 128 == 0 and (ts//4) % 128 == 0  ->  ts % 512 == 0, tr even
        t_req = 512 // math.gcd(W, 512)
        if t_req % 2:
            t_req *= 2
    else:
        t_req = 128 // math.gcd(W, 128)
    tr = t_req * max(1, max_lanes // (t_req * W))
    H_pad = ((H + tr - 1) // tr) * tr
    return H_pad, tr


# ------------------------------- Module glue ------------------------------- #
class CatModule:
    """JAX/Pallas equivalent of the PyTorch `cat` module (BatchNorm in eval mode)."""

    def __init__(self, in_chn_high, in_chn_low, out_chn, upsample=False,
                 key=jax.random.PRNGKey(0)):
        self.do_upsample = upsample
        self.in_chn_high = in_chn_high
        self.in_chn_low = in_chn_low
        cin = in_chn_high + in_chn_low
        k_w, k_b, k_g, k_be, k_m, k_v = jax.random.split(key, 6)
        # Conv2d(cin, out_chn, kernel_size=1) -> weight stored as (out_chn, cin)
        self.conv_w = 0.1 * jax.random.normal(k_w, (out_chn, cin), jnp.float32)
        self.conv_b = 0.1 * jax.random.normal(k_b, (out_chn,), jnp.float32)
        # BatchNorm2d(out_chn) parameters / running stats (deterministic).
        self.bn_gamma = 1.0 + 0.1 * jax.random.normal(k_g, (out_chn,), jnp.float32)
        self.bn_beta = 0.1 * jax.random.normal(k_be, (out_chn,), jnp.float32)
        self.bn_mean = 0.1 * jax.random.normal(k_m, (out_chn,), jnp.float32)
        self.bn_var = jnp.abs(1.0 + 0.1 * jax.random.normal(k_v, (out_chn,), jnp.float32))
        self.bn_eps = 1e-5

    def __call__(self, x, y):
        # x, y are NCHW (PyTorch convention).
        N, cx, hx, wx = x.shape
        Ny, cy, H, W = y.shape
        assert N == Ny and cx == self.in_chn_high and cy == self.in_chn_low
        if self.do_upsample:
            assert H == 2 * hx and W == 2 * wx, "y must be 2x resolution of x"
        else:
            assert H == hx and W == wx, "x and y must share spatial size"
        Cout = self.conv_w.shape[0]

        # Fold eval-mode BatchNorm into the 1x1 conv; split weights so the
        # channel concat is fused into the kernel (z never materialised).
        s = self.bn_gamma / jnp.sqrt(self.bn_var + self.bn_eps)       # (Cout,)
        w_eff = self.conv_w * s[:, None]                              # (Cout, Cin)
        w_x = w_eff[:, :cx]                                           # (Cout, Cx)
        w_y = w_eff[:, cx:]                                           # (Cout, Cy)
        b_eff = (self.conv_b * s + self.bn_beta - self.bn_mean * s).reshape(Cout, 1)

        H_pad, tr = _choose_row_tile(H, W, self.do_upsample)
        if H_pad != H:
            y = jnp.pad(y, ((0, 0), (0, 0), (0, H_pad - H), (0, 0)))
            if self.do_upsample:
                x = jnp.pad(x, ((0, 0), (0, 0), (0, H_pad // 2 - hx), (0, 0)))
            else:
                x = jnp.pad(x, ((0, 0), (0, 0), (0, H_pad - hx), (0, 0)))

        S = H_pad * W
        ts = tr * W
        n_s = H_pad // tr
        grid = (N, n_s)

        # NCHW is row-major in (H, W): flattening spatial to the lane axis is free.
        y_flat = y.reshape(N, cy, S)
        out_shape = jax.ShapeDtypeStruct((N, Cout, S), y.dtype)

        y_spec = pl.BlockSpec((1, cy, ts), lambda n, t: (n, 0, t))
        wx_spec = pl.BlockSpec((Cout, cx), lambda n, t: (0, 0))
        wy_spec = pl.BlockSpec((Cout, cy), lambda n, t: (0, 0))
        b_spec = pl.BlockSpec((Cout, 1), lambda n, t: (0, 0))
        o_spec = pl.BlockSpec((1, Cout, ts), lambda n, t: (n, 0, t))
        cparams = pltpu.CompilerParams(
            dimension_semantics=("parallel", "parallel"))

        if self.do_upsample:
            ts4 = ts // 4
            x_flat = x.reshape(N, cx, S // 4)
            # Constant nearest-2x expansion matrix: G[i, j] = 1 iff half-res
            # flat index i is the source of full-res flat index j.
            j = jnp.arange(ts)
            src = (j // W // 2) * (W // 2) + (j % W) // 2              # (ts,)
            g = (src[None, :] == jnp.arange(ts4)[:, None]).astype(jnp.float32)

            kernel = functools.partial(_cat_conv_bn_relu_up_kernel,
                                       expand_input=(cx <= Cout))
            out_flat = pl.pallas_call(
                kernel,
                out_shape=out_shape,
                grid_spec=pltpu.PrefetchScalarGridSpec(
                    num_scalar_prefetch=0,
                    grid=grid,
                    in_specs=[
                        pl.BlockSpec((1, cx, ts4), lambda n, t: (n, 0, t)),
                        y_spec,
                        pl.BlockSpec((ts4, ts), lambda n, t: (0, 0)),
                        wx_spec, wy_spec, b_spec,
                    ],
                    out_specs=o_spec,
                ),
                compiler_params=cparams,
            )(x_flat, y_flat, g, w_x, w_y, b_eff)
        else:
            x_flat = x.reshape(N, cx, S)
            out_flat = pl.pallas_call(
                _cat_conv_bn_relu_kernel,
                out_shape=out_shape,
                grid_spec=pltpu.PrefetchScalarGridSpec(
                    num_scalar_prefetch=0,
                    grid=grid,
                    in_specs=[
                        pl.BlockSpec((1, cx, ts), lambda n, t: (n, 0, t)),
                        y_spec, wx_spec, wy_spec, b_spec,
                    ],
                    out_specs=o_spec,
                ),
                compiler_params=cparams,
            )(x_flat, y_flat, w_x, w_y, b_eff)

        out = out_flat.reshape(N, Cout, H_pad, W)
        if H_pad != H:
            out = out[:, :, :H, :]
        return out


# --------------------------- reference (pure JAX) --------------------------- #
def _reference(mod, x, y):
    if mod.do_upsample:
        x = jnp.repeat(jnp.repeat(x, 2, axis=2), 2, axis=3)
    z = jnp.concatenate([x, y], axis=1)
    conv = jnp.einsum("nchw,oc->nohw", z, mod.conv_w) + mod.conv_b[None, :, None, None]
    s = mod.bn_gamma / jnp.sqrt(mod.bn_var + mod.bn_eps)
    bn = conv * s[None, :, None, None] + (mod.bn_beta - mod.bn_mean * s)[None, :, None, None]
    return jnp.maximum(bn, 0.0)


if __name__ == "__main__":
    key = jax.random.PRNGKey(0)
    kx, ky, kp = jax.random.split(key, 3)

    in_chn_high, in_chn_low, out_chn = 4, 4, 8
    N, H, W = 2, 16, 16

    # --- upsample=True: x is at half resolution ---
    x = jax.random.normal(kx, (N, in_chn_high, H // 2, W // 2), jnp.float32)
    y = jax.random.normal(ky, (N, in_chn_low, H, W), jnp.float32)

    mod = CatModule(in_chn_high, in_chn_low, out_chn, upsample=True, key=kp)
    out = jax.block_until_ready(mod(x, y))
    ref = _reference(mod, x, y)
    assert out.shape == (N, out_chn, H, W), out.shape
    assert jnp.allclose(out, ref, atol=1e-4, rtol=1e-4), "upsample=True mismatch"

    # --- upsample=False: fused concat only ---
    x2 = jax.random.normal(kx, (N, in_chn_high, H, W), jnp.float32)
    mod2 = CatModule(in_chn_high, in_chn_low, out_chn, upsample=False, key=kp)
    out2 = jax.block_until_ready(mod2(x2, y))
    ref2 = _reference(mod2, x2, y)
    assert out2.shape == (N, out_chn, H, W), out2.shape
    assert jnp.allclose(out2, ref2, atol=1e-4, rtol=1e-4), "upsample=False mismatch"

    print("KERNEL_OK")
</pallas_src>

<mosaic_0001>
module attributes {stable_mosaic.version = 11 : i64} {
  func.func @_cat_conv_bn_relu_up_kernel(%arg0: i32, %arg1: i32, %arg2: memref<1x4x64xf32, #tpu.memory_space<vmem>>, %arg3: memref<1x4x256xf32, #tpu.memory_space<vmem>>, %arg4: memref<64x256xf32, #tpu.memory_space<vmem>>, %arg5: memref<8x4xf32, #tpu.memory_space<vmem>>, %arg6: memref<8x4xf32, #tpu.memory_space<vmem>>, %arg7: memref<8x1xf32, #tpu.memory_space<vmem>>, %arg8: memref<1x8x256xf32, #tpu.memory_space<vmem>>) attributes {dimension_semantics = [#tpu.dimension_semantics<parallel>, #tpu.dimension_semantics<parallel>], iteration_bounds = array<i64: 2, 1>, scalar_prefetch = 0 : i64, scratch_operands = 0 : i64, tpu.core_type = #tpu.core_type<tc>, window_params = [{transform_indices = @transform_0, window_bounds = array<i64: 1, 4, 64>}, {transform_indices = @transform_1, window_bounds = array<i64: 1, 4, 256>}, {pipeline_mode = #tpu.pipeline_mode<synchronous>, transform_indices = @transform_2, window_bounds = array<i64: 64, 256>}, {pipeline_mode = #tpu.pipeline_mode<synchronous>, transform_indices = @transform_3, window_bounds = array<i64: 8, 4>}, {pipeline_mode = #tpu.pipeline_mode<synchronous>, transform_indices = @transform_4, window_bounds = array<i64: 8, 4>}, {pipeline_mode = #tpu.pipeline_mode<synchronous>, transform_indices = @transform_5, window_bounds = array<i64: 8, 1>}, {transform_indices = @transform_6, window_bounds = array<i64: 1, 8, 256>}]} {
    %c0 = arith.constant 0 : index
    %c0_0 = arith.constant 0 : index
    %c0_1 = arith.constant 0 : index
    %0 = vector.load %arg2[%c0, %c0_0, %c0_1] : memref<1x4x64xf32, #tpu.memory_space<vmem>>, vector<1x4x64xf32>
    %1 = vector.shape_cast %0 : vector<1x4x64xf32> to vector<4x64xf32>
    %c0_2 = arith.constant 0 : index
    %c0_3 = arith.constant 0 : index
    %2 = vector.load %arg4[%c0_2, %c0_3] : memref<64x256xf32, #tpu.memory_space<vmem>>, vector<64x256xf32>
    %cst = arith.constant dense<0.000000e+00> : vector<4x256xf32>
    %3 = tpu.matmul %1, %2, %cst {dimension_numbers = #tpu.dot_dimension_numbers<[1], [0], [0], [1], [0, 0, 1, 1], [], []>} : vector<4x64xf32>, vector<64x256xf32>, vector<4x256xf32> -> vector<4x256xf32>
    %c0_4 = arith.constant 0 : index
    %c0_5 = arith.constant 0 : index
    %4 = vector.load %arg5[%c0_4, %c0_5] : memref<8x4xf32, #tpu.memory_space<vmem>>, vector<8x4xf32>
    %cst_6 = arith.constant dense<0.000000e+00> : vector<8x256xf32>
    %5 = tpu.matmul %4, %3, %cst_6 {dimension_numbers = #tpu.dot_dimension_numbers<[1], [0], [0], [1], [0, 0, 1, 1], [], []>} : vector<8x4xf32>, vector<4x256xf32>, vector<8x256xf32> -> vector<8x256xf32>
    %c0_7 = arith.constant 0 : index
    %c0_8 = arith.constant 0 : index
    %6 = vector.load %arg6[%c0_7, %c0_8] : memref<8x4xf32, #tpu.memory_space<vmem>>, vector<8x4xf32>
    %c0_9 = arith.constant 0 : index
    %c0_10 = arith.constant 0 : index
    %c0_11 = arith.constant 0 : index
    %7 = vector.load %arg3[%c0_9, %c0_10, %c0_11] : memref<1x4x256xf32, #tpu.memory_space<vmem>>, vector<1x4x256xf32>
    %8 = vector.shape_cast %7 : vector<1x4x256xf32> to vector<4x256xf32>
    %cst_12 = arith.constant dense<0.000000e+00> : vector<8x256xf32>
    %9 = tpu.matmul %6, %8, %cst_12 {dimension_numbers = #tpu.dot_dimension_numbers<[1], [0], [0], [1], [0, 0, 1, 1], [], []>} : vector<8x4xf32>, vector<4x256xf32>, vector<8x256xf32> -> vector<8x256xf32>
    %10 = arith.addf %5, %9 : vector<8x256xf32>
    %c0_13 = arith.constant 0 : index
    %c0_14 = arith.constant 0 : index
    %11 = vector.load %arg7[%c0_13, %c0_14] : memref<8x1xf32, #tpu.memory_space<vmem>>, vector<8x1xf32>
    %12 = vector.broadcast %11 : vector<8x1xf32> to vector<8x256xf32>
    %13 = arith.addf %10, %12 : vector<8x256xf32>
    %cst_15 = arith.constant 0.000000e+00 : f32
    %14 = vector.broadcast %cst_15 : f32 to vector<8x256xf32>
    %15 = arith.maximumf %13, %14 : vector<8x256xf32>
    %c0_16 = arith.constant 0 : index
    %c0_17 = arith.constant 0 : index
    %c0_18 = arith.constant 0 : index
    %16 = vector.load %arg8[%c0_16, %c0_17, %c0_18] : memref<1x8x256xf32, #tpu.memory_space<vmem>>, vector<1x8x256xf32>
    %17 = vector.shape_cast %16 : vector<1x8x256xf32> to vector<8x256xf32>
    %18 = vector.shape_cast %15 : vector<8x256xf32> to vector<1x8x256xf32>
    tpu.vector_store %arg8[%c0_16, %c0_17, %c0_18], %18 {strides = array<i32>} : memref<1x8x256xf32, #tpu.memory_space<vmem>>, vector<1x8x256xf32>,
    return
  }
  func.func @transform_0(%arg0: i32, %arg1: i32) -> (i32, i32, i32) {
    %c0_i32 = arith.constant 0 : i32
    %c0_i32_0 = arith.constant 0 : i32
    return %arg0, %c0_i32, %arg1 : i32, i32, i32
  }
  func.func @transform_1(%arg0: i32, %arg1: i32) -> (i32, i32, i32) {
    %c0_i32 = arith.constant 0 : i32
    %c0_i32_0 = arith.constant 0 : i32
    return %arg0, %c0_i32, %arg1 : i32, i32, i32
  }
  func.func @transform_2(%arg0: i32, %arg1: i32) -> (i32, i32) {
    %c0_i32 = arith.constant 0 : i32
    %c0_i32_0 = arith.constant 0 : i32
    %c0_i32_1 = arith.constant 0 : i32
    return %c0_i32, %c0_i32_0 : i32, i32
  }
  func.func @transform_3(%arg0: i32, %arg1: i32) -> (i32, i32) {
    %c0_i32 = arith.constant 0 : i32
    %c0_i32_0 = arith.constant 0 : i32
    %c0_i32_1 = arith.constant 0 : i32
    return %c0_i32, %c0_i32_0 : i32, i32
  }
  func.func @transform_4(%arg0: i32, %arg1: i32) -> (i32, i32) {
    %c0_i32 = arith.constant 0 : i32
    %c0_i32_0 = arith.constant 0 : i32
    %c0_i32_1 = arith.constant 0 : i32
    return %c0_i32, %c0_i32_0 : i32, i32
  }
  func.func @transform_5(%arg0: i32, %arg1: i32) -> (i32, i32) {
    %c0_i32 = arith.constant 0 : i32
    %c0_i32_0 = arith.constant 0 : i32
    %c0_i32_1 = arith.constant 0 : i32
    return %c0_i32, %c0_i32_0 : i32, i32
  }
  func.func @transform_6(%arg0: i32, %arg1: i32) -> (i32, i32, i32) {
    %c0_i32 = arith.constant 0 : i32
    %c0_i32_0 = arith.constant 0 : i32
    return %arg0, %c0_i32, %arg1 : i32, i32, i32
  }
}

</mosaic_0001>

<bundles_post_ra>
// kernel: tpu_custom_call.1
= control target key start
LH: loop header
LB: loop body
LE: loop exit
PB: predicated region body
PF: predicated region fallthrough
CT: control target
= control target key end

     0   :  { %11 = vsyncpa [#allocation3], 0  ;;  %s1099_s0 = inlined_call_operand.vmem [shape: f32[2,4,64], index: 0, kind: input, shape index: {}]   ;;  %s1100_s1 = inlined_call_operand.vmem [shape: f32[2,4,256], index: 1, kind: input, shape index: {}]   ;;  %s1101_s2 = inlined_call_operand.hbm [shape: f32[64,256], index: 2, kind: input, shape index: {}]   ;;  %s1102_s3 = inlined_call_operand.vmem [shape: f32[8,4], index: 3, kind: input, shape index: {}]   ;;  %s1103_s4 = inlined_call_operand.vmem [shape: f32[8,4], index: 4, kind: input, shape index: {}]   ;;  %s1104_s5 = inlined_call_operand.vmem [shape: f32[8,1], index: 5, kind: input, shape index: {}]   ;;  %s1105_s6 = inlined_call_operand.hbm [shape: f32[2,8,256], index: 6, kind: output, shape index: {}]  }
   0x1   :  { %12 = vsyncpa [#allocation4], 0 }
   0x2   :  { %14 = vsyncpa [#allocation4 + $0x1], 0  ;;  %s959_s21 = smov 0   ;;  %s961_s22 = smov 0  }
   0x3   :  { %s963_s23 = smov 0   ;;  %s965_s24 = smov 0  }
   0x4   :  { %s967_s25 = smov 0   ;;  %s969_s26 = smov 0  }
   0x5 LB: > { %s713_s27 = sadd.s32 4294967295, %s916_s26   ;;  %s714_s28 = sadd.s32 4294967294, %s916_s26   ;;  %s916_s26 = sphi %s969_s26, %s20_s26   ;;  %s912_s25 = sphi %s967_s25, %s1114_s25   ;;  %s908_s24 = sphi %s965_s24, %s1113_s24   ;;  %s904_s23 = sphi %s963_s23, %s1112_s23   ;;  %s900_s22 = sphi %s961_s22, %s1111_s22   ;;  %s896_s21 = sphi %s959_s21, %s1110_s21  }
   0x6   : > { %s32_s29 = sadd.s32 1, %s912_s25  ;;  %s181_s30 = sadd.s32 1, %s904_s23 }
   0x7   : > { %p34_p0 = scmp.ge.s32.totalorder %s32_s29, 2  ;;  %p191_p1 = scmp.ne.s32.totalorder %s904_s23, %s900_s22 }
   0x8   : > { %p192_p2 = scmp.eq.s32.totalorder %s713_s27, 1  ;;  %p197_p3 = scmp.ne.s32.totalorder %s900_s22, %s896_s21 }
   0x9   : > { %s1116_s29 = smov (%p34_p0, %s32_s29), 0  ;;  %p198_p5 = scmp.eq.s32.totalorder %s714_s28, 1 }
   0xa   : > { %p999_p4 = por %p192_p2, %p191_p1  ;;  %s176_s8 = ssub.s32 %s912_s25, %s1116_s29 }
   0xb   : > { %p715_p6 = scmp.ge.s32.totalorder %s916_s26, 1  ;;  %p179_p7 = scmp.eq.s32.totalorder %s176_s8, 0 }
   0xc   : > { %p1006_p8 = por %p198_p5, %p197_p3  ;;  %p205_p9 = scmp.lt.s32.totalorder %s916_s26, 3 }
   0xd   : > { %s1012_s10 = scalar_select %p179_p7, %s904_s23, %s181_s30  }
   0xe   : > { %p1014_p10 = pnand %p715_p6, %p205_p9  ;;  %p1018_p11 = scmp.eq.s32.totalorder %s713_s27, 0 }
   0xf   : > { %s918_s13 = smov [#allocation2]  }
  0x10   : > { %p744_p12 = pneg %p1014_p10  ;;  %s217_s14 = sshll.u32 %s918_s13, 4  ;;  %s218_s14 = int_to_ptr.vmem [resolvable:$true] %s217_s14 }
  0x11   : > { %s821_s15 = scalar_lea.vmem %s218_s14, 2048  ;;  %p829_p5 = scmp.lt.s32.totalorder %s218_s14, %s218_s14 }
  0x12   : > { %p745_p13 = pnand %p1018_p11, %p744_p12  ;;  %p822_p1 = scmp.ne.s32.totalorder %s218_s14, %s821_s15 }
  0x13   : > { %p830_p6 = scmp.lt.s32.totalorder %s821_s15, %s821_s15 }
  0x14   : > { %p812_p0 = pneg %p745_p13 }
  0x15   : > { %p831_p7 = por %p830_p6, %p829_p5 }
  0x16   : > { %p824_p2 = pnand %p822_p1, %p812_p0 }
  0x18   : > { %p825_p3 = pneg %p824_p2 }
  0x1a   : > { %p832_p9 = pnand %p831_p7, %p825_p3 }
  0x1c   : > { %835 = shalt.err (!%p832_p9)
}
  0x1d   : > { %s919_s16 = smov 256   ;;  %s920_s17 = smov 16  }
  0x1e   : > { %747 = dma.hbm_to_vmem [thread:$0]  (!%p745_p13), %s1101_s2, 2048, %s218_s14, [#allocation3], %s919_s16, %s919_s16, %s920_s17  }
  0x1f   : > { %265 = sbr.rel (%p1014_p10) target bundleno = 466 (0x1d2), region = 44 }
  0x24   : > { %887 = dma.done.wait (%p1018_p11), [#allocation3], 2048  }
  0x25   : > { %889 = vsyncadd (%p1018_p11), [#allocation3], 4294965248  ;;  %p306_p12 = scmp.lt.s32.totalorder %s908_s24, 1  ;;  %v921_v0 = vmov 0.0   ;;  %v340_v1 = vld [vmem:[#allocation2 + $0x78] sm:$0xff]  ;;  %v339_v2 = vld [vmem:[#allocation2 + $0x70] sm:$0xff] }
  0x26   : > { %409 = vmatprep.mubr.f32.mxu0 %v921_v0  ;;  %494 = vmatprep.mubr.f32.mxu1 %v921_v0  ;;  %v338_v3 = vld [vmem:[#allocation2 + $0x68] sm:$0xff]  ;;  %v337_v4 = vld [vmem:[#allocation2 + $0x60] sm:$0xff]  ;;  %v336_v5 = vld [vmem:[#allocation2 + $0x58] sm:$0xff]  ;;  %vm425_vm0 = vcmask 1043456   ;;  %vm341_vm1 = vcmask 523264   ;;  %vm421_vm2 = vcmask 31744  }
  0x27   : > { %s1037_s20 = scalar_select %p306_p12, %s908_s24, 1  ;;  %361 = vmatprep.subr.mxu0 %v340_v1  ;;  %v335_v6 = vld [vmem:[#allocation2 + $0x50] sm:$0xff]  ;;  %v334_v7 = vld [vmem:[#allocation2 + $0x48] sm:$0xff]  ;;  %v333_v8 = vld [vmem:[#allocation2 + $0x40] sm:$0xff]  ;;  %v922_v22 = vmov 0  }
  0x28   : > { %362 = vmatpush1.msra.mxu0 %v339_v2  ;;  %v332_v10 = vld [vmem:[#allocation2 + $0x38] sm:$0xff]  ;;  %v331_v12 = vld [vmem:[#allocation2 + $0x30] sm:$0xff]  ;;  %v330_v13 = vld [vmem:[#allocation2 + $0x28] sm:$0xff]  ;;  %808 = vset.pattern.permute.xlu0 %v922_v22  ;;  %s737_s30 = sshll.u32 %s908_s24, 8  ;;  %s923_s17 = smov [#allocation5]  }
  0x29   : > { %s736_s27 = sshll.u32 %s1037_s20, 3  ;;  %363 = vmatprep.subr.mxu0 %v338_v3  ;;  %s721_s11 = sshll.u32 %s1037_s20, 2  ;;  %v329_v14 = vld [vmem:[#allocation2 + $0x20] sm:$0xff]  ;;  %v328_v15 = vld [vmem:[#allocation2 + $0x18] sm:$0xff]  ;;  %v327_v16 = vld [vmem:[#allocation2 + $0x10] sm:$0xff] }
  0x2a   : > { %s321_s8 = scalar_lea.vmem %s1100_s1, %s736_s27  ;;  %364 = vmatpush1.msra.mxu0 %v337_v4  ;;  %s312_s14 = scalar_lea.vmem %s1099_s0, %s721_s11  ;;  %v326_v17 = vld [vmem:[#allocation2 + $0x8] sm:$0xff]  ;;  %v325_v18 = vld [vmem:[#allocation2] sm:$0xff] }
  0x2b   : > { %365 = vmatprep.subr.mxu0 %v336_v5  ;;  %v418_v9 = vld [vmem:[%s321_s8] sm:$0xff]  ;;  %s303_s27 = sand.u32 1, %s900_s22   ;;  %s840_s24 = sshll.u32 %s923_s17, 4  ;;  %s841_s24 = int_to_ptr.vmem [resolvable:$false] %s840_s24 }
  0x2c   : > { %366 = vmatpush1.msra.mxu0 %v335_v6  ;;  %v420_v11 = vcombine.high %v418_v9, %v418_v9  ;;  %v324_v19 = vld [vmem:[%s312_s14] sm:$0xf]  ;;  %s720_s28 = sshll.u32 %s303_s27, 4  ;;  %s608_s14 = scalar_lea.hbm %s1105_s6, %s737_s30 }
  0x2d   : > { %367 = vmatprep.subr.mxu0 %v334_v7  ;;  %v417_v20 = vld [vmem:[%s1103_s4] sm:$0xff]  ;;  %s305_s8 = scalar_lea.vmem [#allocation5], %s720_s28  ;;  %s594_s15 = scalar_lea.sflag [#allocation4], %s303_s27 }
  0x2e   : > { %368 = vmatpush1.msra.mxu0 %v333_v8  ;;  %725 = vmatprep.subr.msk.mxu1 %vm425_vm0, %v420_v11  ;;  %v581_v21 = vld [vmem:[%s1104_s5] sm:$0xff]  ;;  %s610_s11 = sshll.u32 %s305_s8, 4  ;;  %s842_s18 = scalar_lea.vmem %s841_s24, 512  ;;  %s611_s11 = int_to_ptr.vmem [resolvable:$true] %s610_s11 }
  0x2f   : > { %369 = vmatprep.subr.mxu0 %v332_v10  ;;  %726 = vmatpush1.msk.msra.mxu1 %vm425_vm0, %v418_v9  ;;  %v416_v25 = vld [vmem:[%s1102_s3] sm:$0xff]  ;;  %s836_s16 = scalar_lea.vmem %s611_s11, 256  ;;  %p843_p0 = scmp.lt.s32.totalorder %s611_s11, %s841_s24 }
  0x30   : > { %370 = vmatpush1.msra.mxu0 %v331_v12  ;;  %727 = vmatmul.mubr.msk.f32.vlgmr.msra.gmra.mxu1 %vm421_vm2, %v417_v20  ;;  %p837_p10 = scmp.ne.s32.totalorder %s611_s11, %s836_s16  ;;  %p844_p1 = scmp.lt.s32.totalorder %s842_s18, %s836_s16 }
  0x31   : > { %371 = vmatprep.subr.mxu0 %v330_v13  ;;  %574 = vmatprep.mubr.f32.mxu1 %v921_v0 }
  0x32   : > { %372 = vmatpush1.msra.mxu0 %v329_v14  ;;  %584 = vperm.xlu0 %808, %v581_v21   ;;  %p838_p11 = pnand %p837_p10, %p999_p4  ;;  %p845_p2 = por %p844_p1, %p843_p0 }
  0x33   : > { %373 = vmatprep.subr.mxu0 %v328_v15 }
  0x34   : > { %374 = vmatpush1.msra.mxu0 %v327_v16  ;;  %p839_p13 = pneg %p838_p11 }
  0x35   : > { %375 = vmatprep.subr.mxu0 %v326_v17 }
  0x36   : > { %376 = vmatpush1.msra.mxu0 %v325_v18  ;;  %p846_p3 = pnand %p845_p2, %p839_p13 }
  0x37   : > { %724 = vmatmul.mubr.msk.f32.vlgmr.msra.gmra.mxu0 %vm341_vm1, %v324_v19 }
  0xad   : > { %v585_v29 = vpop.permute.xlu0 %584 }
  0xf0   : > { %v496_v26 = vpop.f32.mrf.mxu1 }
  0xf2   : > { %v498_v27 = vpop.f32.mrf.mxu1 }
  0xf7   : > { %v411_v23 = vpop.f32.mrf.mxu0 }
  0xf9   : > { %v413_v24 = vpop.f32.mrf.mxu0 }
  0xfa   : > { %728 = vmatprep.subr.msk.mxu1 %vm425_vm0, %v413_v24 }
  0xfb   : > { %729 = vmatpush1.msk.msra.mxu1 %vm425_vm0, %v411_v23 }
  0xfc   : > { %730 = vmatmul.mubr.msk.f32.vlgmr.msra.gmra.mxu1 %vm421_vm2, %v416_v25 }
 0x1bc   : > { %v576_v28 = vpop.f32.mrf.mxu1 }
 0x1bd   : > { %v577_v30 = vadd.f32 %v576_v28, %v496_v26 }
 0x1be   : > { %v578_v31 = vpop.f32.mrf.mxu1 }
 0x1bf   : > { %v587_v32 = vadd.f32 %v585_v29, %v577_v30  ;;  %v579_v33 = vadd.f32 %v578_v31, %v498_v27 }
 0x1c1   : > { %v589_v34 = vmax.f32 %v587_v32, 0.0  ;;  %v588_v35 = vadd.f32 %v585_v29, %v579_v33 }
 0x1c3   : > { %591 = vst [vmem:[%s305_s8] sm:$0xff] %v589_v34  ;;  %v590_v36 = vmax.f32 %v588_v35, 0.0 }
 0x1c5   : > { %592 = vst [vmem:[%s305_s8 + $0x8] sm:$0xff] %v590_v36 }
 0x1c6   : > { %849 = shalt.err (!%p846_p3)
}
 0x1c7   : > { %s850_s19 = scalar_lea.hbm %s608_s14, 256  ;;  %s854_s28 = scalar_lea.hbm %s1105_s6, 512 }
 0x1c8   : > { %p851_p5 = scmp.ne.s32.totalorder %s608_s14, %s850_s19  ;;  %p855_p9 = scmp.lt.s32.totalorder %s608_s14, %s1105_s6 }
 0x1c9   : > { %p856_p12 = scmp.lt.s32.totalorder %s854_s28, %s850_s19 }
 0x1ca   : > { %p852_p6 = pnand %p851_p5, %p999_p4 }
 0x1cb   : > { %p857_p10 = por %p856_p12, %p855_p9 }
 0x1cc   : > { %p853_p7 = pneg %p852_p6 }
 0x1ce   : > { %p858_p11 = pnand %p857_p10, %p853_p7 }
 0x1d0   : > { %861 = shalt.err (!%p858_p11)
}
 0x1d1   : > { %742 = dma.vmem_to_hbm [thread:$0]  (%p999_p4), %s611_s11, 256, %s608_s14, %s594_s15  }
 0x1d2 PF: > { %p754_p13 = scmp.ge.s32.totalorder %s916_s26, 2  ;;  %s622_s12 = sand.u32 1, %s896_s21  }
 0x1d3   : > { %s623_s13 = scalar_lea.sflag [#allocation4], %s622_s12 }
 0x1d4   : > { %p749_p0 = pnand %p754_p13, %p1006_p8 }
 0x1d6   : > { %p750_p1 = pneg %p749_p0 }
 0x1d8   : > { %891 = dma.done.wait (%p750_p1), %s623_s13, 256  }
 0x1d9   : > { %893 = vsyncadd (%p750_p1), %s623_s13, 4294967040  ;;  %s20_s26 = sadd.s32 1, %s916_s26   ;;  %s1110_s21 = smov %s900_s22 }
 0x1da   : > { %p17_p2 = scmp.ge.s32.totalorder %s20_s26, 4   ;;  %s1111_s22 = smov %s904_s23 }
 0x1db   : > { %s1112_s23 = smov %s1012_s10  ;;  %s1113_s24 = smov %s912_s25 }
 0x1dc   : > { %s1114_s25 = smov %s1116_s29  ;;  %19 = sbr.rel (!%p17_p2) target bundleno = 5 (0x5), region = 87 }
 0x1e1   :  { %628 = vsyncpa [#allocation3], 1 }
 0x1e2   :  { %630 = vsyncpa [#allocation3 + $0x1], 1 }
 0x1e3   :  { %631 = vsyncpa [#allocation4], 1 }
 0x1e4   :  { %633 = vsyncpa [#allocation4 + $0x1], 1 }

</bundles_post_ra>
